<compile_context>
chip_gen: v7x
topology: tpu7x:2x2x1
jax: 0.10.0
libtpu: 0.0.40
codegen_flags: <defaults>
</compile_context>

<pallas_src>
import functools

import jax
import jax.numpy as jnp
from jax.experimental import pallas as pl
from jax.experimental.pallas import tpu as pltpu


# ------------------------------ fused kernel -------------------------------

def _masked_attention_kernel(x_ref, wqkv_ref, wproj_ref, bproj_ref, o_ref,
                             ctx_ref, *, num_heads, scale, is_query):
    """Fused qkv-projection + masked attention + output projection.

    Refs (one batch element per grid step):
      x_ref:     (N, C)       input tokens
      wqkv_ref:  (C, 3C)      qkv weight (stored as W^T)
      wproj_ref: (C, C)       proj weight (stored as W^T)
      bproj_ref: (1, C)       proj bias
      o_ref:     (N, C)       output
      ctx_ref:   (N, C) f32   VMEM scratch: merged per-head attention context
    """
    N, C = x_ref.shape
    H = num_heads
    D = C // H

    x = x_ref[...].astype(jnp.float32)

    # qkv projection: (N, C) @ (C, 3C) -> (N, 3C); MXU, f32 accumulation.
    qkv = jnp.dot(x, wqkv_ref[...].astype(jnp.float32),
                  preferred_element_type=jnp.float32)

    # Per-head attention.  Heads are static lane slices of the qkv slab
    # (channel layout is [q|k|v] x [head-major, dim-minor], matching torch's
    # reshape(B, N, 3, H, D)).
    for h in range(H):
        q = qkv[:, h * D:(h + 1) * D]                     # (N, D)
        k = qkv[:, C + h * D:C + (h + 1) * D]             # (N, D)
        v = qkv[:, 2 * C + h * D:2 * C + (h + 1) * D]     # (N, D)

        if is_query:
            # mask tokens whose per-head q "energy" is <= the per-head mean
            q_scores = jnp.sum(q * q, axis=-1, keepdims=True)    # (N, 1)
            q_mean = jnp.mean(q_scores, axis=0, keepdims=True)   # (1, 1)
            q = q * (q_scores > q_mean).astype(jnp.float32)

        # scores = (q @ k^T) * scale, contracting on D -- no materialized k.T
        s = jax.lax.dot_general(
            q, k, (((1,), (1,)), ((), ())),
            preferred_element_type=jnp.float32) * scale          # (N, N)

        # numerically-stable softmax; reciprocal runs on the EUP slot
        s = s - jnp.max(s, axis=-1, keepdims=True)
        p = jnp.exp(s)
        p = p * pl.reciprocal(jnp.sum(p, axis=-1, keepdims=True), approx=True)

        # context = attn @ v ; write head h's columns of the merged slab
        ctx_ref[:, h * D:(h + 1) * D] = jnp.dot(
            p, v, preferred_element_type=jnp.float32)

    # Output projection on the lane-dense (N, C) context; lane-dense store.
    out = jnp.dot(ctx_ref[...], wproj_ref[...].astype(jnp.float32),
                  preferred_element_type=jnp.float32)
    out = out + bproj_ref[...].astype(jnp.float32)
    o_ref[...] = out.astype(o_ref.dtype)


# ------------------------------ JAX wrapper --------------------------------

def masked_attention_forward(x, w_qkv, w_proj, b_proj, *, num_heads,
                             is_query=False):
    """Pallas implementation of MaskedAttention.forward (inference mode).

    x:      (B, N, C)
    w_qkv:  (C, 3C)   -- transposed relative to torch's Linear.weight
    w_proj: (C, C)    -- transposed
    b_proj: (1, C)
    """
    B, N, C = x.shape
    H = num_heads
    D = C // H
    scale = D ** (-0.5)

    kernel = functools.partial(
        _masked_attention_kernel, num_heads=H, scale=scale, is_query=is_query)

    return pl.pallas_call(
        kernel,
        out_shape=jax.ShapeDtypeStruct((B, N, C), x.dtype),
        grid=(B,),
        in_specs=[
            pl.BlockSpec((None, N, C), lambda b: (b, 0, 0)),   # x (per batch)
            pl.BlockSpec((C, 3 * C), lambda b: (0, 0)),        # w_qkv (invariant)
            pl.BlockSpec((C, C), lambda b: (0, 0)),            # w_proj (invariant)
            pl.BlockSpec((1, C), lambda b: (0, 0)),            # b_proj (invariant)
        ],
        out_specs=pl.BlockSpec((None, N, C), lambda b: (b, 0, 0)),
        scratch_shapes=[pltpu.VMEM((N, C), jnp.float32)],
        compiler_params=pltpu.CompilerParams(
            dimension_semantics=("parallel",)),
    )(x, w_qkv, w_proj, b_proj)


# ------------------------------ pure-JAX ref -------------------------------

def _reference_forward(x, w_qkv, w_proj, b_proj, *, num_heads, is_query=False):
    B, N, C = x.shape
    H = num_heads
    D = C // H
    scale = D ** (-0.5)

    qkv = (x.reshape(B * N, C) @ w_qkv).reshape(B, N, 3, H, D)
    qkv = qkv.transpose(2, 0, 3, 1, 4)
    q, k, v = qkv[0], qkv[1], qkv[2]
    if is_query:
        q_scores = jnp.sum(q * q, axis=-1, keepdims=True)
        q_mean = jnp.mean(q_scores, axis=-2, keepdims=True)
        q_mask = (q_scores > q_mean).astype(q.dtype)
        q = q * q_mask
    attn = jnp.einsum("bhnd,bhmd->bhnm", q, k) * scale
    attn = jax.nn.softmax(attn, axis=-1)
    out = jnp.einsum("bhnm,bhmd->bhnd", attn, v)
    out = out.transpose(0, 2, 1, 3).reshape(B * N, C)
    out = out @ w_proj + b_proj
    return out.reshape(B, N, C)


# ---------------------------------- main -----------------------------------

if __name__ == "__main__":
    B, N, C = 2, 8, 32
    num_heads = 8  # head_dim = 4

    key = jax.random.PRNGKey(0)
    kx, kqkv, kproj, kbias = jax.random.split(key, 4)

    x = jax.random.normal(kx, (B, N, C), dtype=jnp.float32)
    # nn.Linear(dim, dim*3, bias=False): weight (3C, C) -> store W^T = (C, 3C)
    w_qkv = 0.05 * jax.random.normal(kqkv, (C, 3 * C), dtype=jnp.float32)
    # nn.Linear(dim, dim): weight (C, C) -> W^T = (C, C); bias (C,) -> (1, C)
    w_proj = 0.05 * jax.random.normal(kproj, (C, C), dtype=jnp.float32)
    b_proj = 0.05 * jax.random.normal(kbias, (1, C), dtype=jnp.float32)

    for is_query in (False, True):
        out = masked_attention_forward(
            x, w_qkv, w_proj, b_proj, num_heads=num_heads, is_query=is_query
        )
        out = jax.block_until_ready(out)
        ref = _reference_forward(
            x, w_qkv, w_proj, b_proj, num_heads=num_heads, is_query=is_query
        )
        assert out.shape == (B, N, C)
        # Tolerance accounts for the EUP approximate reciprocal in the softmax.
        assert jnp.allclose(out, ref, atol=2e-3, rtol=2e-3), (
            f"mismatch (is_query={is_query}): max err "
            f"{float(jnp.max(jnp.abs(out - ref)))}"
        )

    print("KERNEL_OK")
</pallas_src>

<mosaic_0001>
module attributes {stable_mosaic.version = 11 : i64} {
  func.func @_masked_attention_kernel(%arg0: i32, %arg1: memref<1x8x32xf32, #tpu.memory_space<vmem>>, %arg2: memref<32x96xf32, #tpu.memory_space<vmem>>, %arg3: memref<32x32xf32, #tpu.memory_space<vmem>>, %arg4: memref<1x32xf32, #tpu.memory_space<vmem>>, %arg5: memref<1x8x32xf32, #tpu.memory_space<vmem>>, %arg6: memref<8x32xf32, #tpu.memory_space<vmem>>) attributes {dimension_semantics = [#tpu.dimension_semantics<parallel>], iteration_bounds = array<i64: 2>, scalar_prefetch = 0 : i64, scratch_operands = 1 : i64, tpu.core_type = #tpu.core_type<tc>, window_params = [{transform_indices = @transform_0, window_bounds = array<i64: 1, 8, 32>}, {pipeline_mode = #tpu.pipeline_mode<synchronous>, transform_indices = @transform_1, window_bounds = array<i64: 32, 96>}, {pipeline_mode = #tpu.pipeline_mode<synchronous>, transform_indices = @transform_2, window_bounds = array<i64: 32, 32>}, {pipeline_mode = #tpu.pipeline_mode<synchronous>, transform_indices = @transform_3, window_bounds = array<i64: 1, 32>}, {transform_indices = @transform_4, window_bounds = array<i64: 1, 8, 32>}]} {
    %c0 = arith.constant 0 : index
    %c0_0 = arith.constant 0 : index
    %c0_1 = arith.constant 0 : index
    %0 = vector.load %arg1[%c0, %c0_0, %c0_1] : memref<1x8x32xf32, #tpu.memory_space<vmem>>, vector<1x8x32xf32>
    %1 = vector.shape_cast %0 : vector<1x8x32xf32> to vector<8x32xf32>
    %c0_2 = arith.constant 0 : index
    %c0_3 = arith.constant 0 : index
    %2 = vector.load %arg2[%c0_2, %c0_3] : memref<32x96xf32, #tpu.memory_space<vmem>>, vector<32x96xf32>
    %cst = arith.constant dense<0.000000e+00> : vector<8x96xf32>
    %3 = tpu.matmul %1, %2, %cst {dimension_numbers = #tpu.dot_dimension_numbers<[1], [0], [0], [1], [0, 0, 1, 1], [], []>} : vector<8x32xf32>, vector<32x96xf32>, vector<8x96xf32> -> vector<8x96xf32>
    %4 = vector.extract_strided_slice %3 {offsets = [0, 0], sizes = [8, 4], strides = [1, 1]} : vector<8x96xf32> to vector<8x4xf32>
    %5 = vector.extract_strided_slice %3 {offsets = [0, 32], sizes = [8, 4], strides = [1, 1]} : vector<8x96xf32> to vector<8x4xf32>
    %6 = vector.extract_strided_slice %3 {offsets = [0, 64], sizes = [8, 4], strides = [1, 1]} : vector<8x96xf32> to vector<8x4xf32>
    %cst_4 = arith.constant dense<0.000000e+00> : vector<8x8xf32>
    %7 = tpu.matmul %4, %5, %cst_4 {dimension_numbers = #tpu.dot_dimension_numbers<[1], [1], [0], [0], [0, 0, 1, 0], [], []>} : vector<8x4xf32>, vector<8x4xf32>, vector<8x8xf32> -> vector<8x8xf32>
    %cst_5 = arith.constant 5.000000e-01 : f32
    %8 = vector.broadcast %cst_5 : f32 to vector<8x8xf32>
    %9 = arith.mulf %7, %8 : vector<8x8xf32>
    %cst_6 = arith.constant dense<0xFF800000> : vector<8xf32>
    %10 = vector.multi_reduction <maximumf>, %9, %cst_6 [1] : vector<8x8xf32> to vector<8xf32>
    %11 = vector.shape_cast %10 : vector<8xf32> to vector<8x1xf32>
    %12 = vector.broadcast %11 : vector<8x1xf32> to vector<8x8xf32>
    %13 = arith.subf %9, %12 : vector<8x8xf32>
    %14 = math.exp %13 : vector<8x8xf32>
    %cst_7 = arith.constant dense<0.000000e+00> : vector<8xf32>
    %15 = vector.multi_reduction <add>, %14, %cst_7 [1] : vector<8x8xf32> to vector<8xf32>
    %16 = vector.shape_cast %15 : vector<8xf32> to vector<8x1xf32>
    %17 = tpu.reciprocal %16 {approx = true} : vector<8x1xf32> -> vector<8x1xf32>
    %18 = vector.broadcast %17 : vector<8x1xf32> to vector<8x8xf32>
    %19 = arith.mulf %14, %18 : vector<8x8xf32>
    %cst_8 = arith.constant dense<0.000000e+00> : vector<8x4xf32>
    %20 = tpu.matmul %19, %6, %cst_8 {dimension_numbers = #tpu.dot_dimension_numbers<[1], [0], [0], [1], [0, 0, 1, 1], [], []>} : vector<8x8xf32>, vector<8x4xf32>, vector<8x4xf32> -> vector<8x4xf32>
    %c0_9 = arith.constant 0 : index
    %c0_10 = arith.constant 0 : index
    %21 = vector.load %arg6[%c0_9, %c0_10] : memref<8x32xf32, #tpu.memory_space<vmem>>, vector<8x4xf32>
    tpu.vector_store %arg6[%c0_9, %c0_10], %20 {strides = array<i32>} : memref<8x32xf32, #tpu.memory_space<vmem>>, vector<8x4xf32>,
    %22 = vector.extract_strided_slice %3 {offsets = [0, 4], sizes = [8, 4], strides = [1, 1]} : vector<8x96xf32> to vector<8x4xf32>
    %23 = vector.extract_strided_slice %3 {offsets = [0, 36], sizes = [8, 4], strides = [1, 1]} : vector<8x96xf32> to vector<8x4xf32>
    %24 = vector.extract_strided_slice %3 {offsets = [0, 68], sizes = [8, 4], strides = [1, 1]} : vector<8x96xf32> to vector<8x4xf32>
    %cst_11 = arith.constant dense<0.000000e+00> : vector<8x8xf32>
    %25 = tpu.matmul %22, %23, %cst_11 {dimension_numbers = #tpu.dot_dimension_numbers<[1], [1], [0], [0], [0, 0, 1, 0], [], []>} : vector<8x4xf32>, vector<8x4xf32>, vector<8x8xf32> -> vector<8x8xf32>
    %cst_12 = arith.constant 5.000000e-01 : f32
    %26 = vector.broadcast %cst_12 : f32 to vector<8x8xf32>
    %27 = arith.mulf %25, %26 : vector<8x8xf32>
    %cst_13 = arith.constant dense<0xFF800000> : vector<8xf32>
    %28 = vector.multi_reduction <maximumf>, %27, %cst_13 [1] : vector<8x8xf32> to vector<8xf32>
    %29 = vector.shape_cast %28 : vector<8xf32> to vector<8x1xf32>
    %30 = vector.broadcast %29 : vector<8x1xf32> to vector<8x8xf32>
    %31 = arith.subf %27, %30 : vector<8x8xf32>
    %32 = math.exp %31 : vector<8x8xf32>
    %cst_14 = arith.constant dense<0.000000e+00> : vector<8xf32>
    %33 = vector.multi_reduction <add>, %32, %cst_14 [1] : vector<8x8xf32> to vector<8xf32>
    %34 = vector.shape_cast %33 : vector<8xf32> to vector<8x1xf32>
    %35 = tpu.reciprocal %34 {approx = true} : vector<8x1xf32> -> vector<8x1xf32>
    %36 = vector.broadcast %35 : vector<8x1xf32> to vector<8x8xf32>
    %37 = arith.mulf %32, %36 : vector<8x8xf32>
    %cst_15 = arith.constant dense<0.000000e+00> : vector<8x4xf32>
    %38 = tpu.matmul %37, %24, %cst_15 {dimension_numbers = #tpu.dot_dimension_numbers<[1], [0], [0], [1], [0, 0, 1, 1], [], []>} : vector<8x8xf32>, vector<8x4xf32>, vector<8x4xf32> -> vector<8x4xf32>
    %c0_16 = arith.constant 0 : index
    %c4 = arith.constant 4 : index
    %39 = vector.load %arg6[%c0_16, %c4] : memref<8x32xf32, #tpu.memory_space<vmem>>, vector<8x4xf32>
    tpu.vector_store %arg6[%c0_16, %c4], %38 {strides = array<i32>} : memref<8x32xf32, #tpu.memory_space<vmem>>, vector<8x4xf32>,
    %40 = vector.extract_strided_slice %3 {offsets = [0, 8], sizes = [8, 4], strides = [1, 1]} : vector<8x96xf32> to vector<8x4xf32>
    %41 = vector.extract_strided_slice %3 {offsets = [0, 40], sizes = [8, 4], strides = [1, 1]} : vector<8x96xf32> to vector<8x4xf32>
    %42 = vector.extract_strided_slice %3 {offsets = [0, 72], sizes = [8, 4], strides = [1, 1]} : vector<8x96xf32> to vector<8x4xf32>
    %cst_17 = arith.constant dense<0.000000e+00> : vector<8x8xf32>
    %43 = tpu.matmul %40, %41, %cst_17 {dimension_numbers = #tpu.dot_dimension_numbers<[1], [1], [0], [0], [0, 0, 1, 0], [], []>} : vector<8x4xf32>, vector<8x4xf32>, vector<8x8xf32> -> vector<8x8xf32>
    %cst_18 = arith.constant 5.000000e-01 : f32
    %44 = vector.broadcast %cst_18 : f32 to vector<8x8xf32>
    %45 = arith.mulf %43, %44 : vector<8x8xf32>
    %cst_19 = arith.constant dense<0xFF800000> : vector<8xf32>
    %46 = vector.multi_reduction <maximumf>, %45, %cst_19 [1] : vector<8x8xf32> to vector<8xf32>
    %47 = vector.shape_cast %46 : vector<8xf32> to vector<8x1xf32>
    %48 = vector.broadcast %47 : vector<8x1xf32> to vector<8x8xf32>
    %49 = arith.subf %45, %48 : vector<8x8xf32>
    %50 = math.exp %49 : vector<8x8xf32>
    %cst_20 = arith.constant dense<0.000000e+00> : vector<8xf32>
    %51 = vector.multi_reduction <add>, %50, %cst_20 [1] : vector<8x8xf32> to vector<8xf32>
    %52 = vector.shape_cast %51 : vector<8xf32> to vector<8x1xf32>
    %53 = tpu.reciprocal %52 {approx = true} : vector<8x1xf32> -> vector<8x1xf32>
    %54 = vector.broadcast %53 : vector<8x1xf32> to vector<8x8xf32>
    %55 = arith.mulf %50, %54 : vector<8x8xf32>
    %cst_21 = arith.constant dense<0.000000e+00> : vector<8x4xf32>
    %56 = tpu.matmul %55, %42, %cst_21 {dimension_numbers = #tpu.dot_dimension_numbers<[1], [0], [0], [1], [0, 0, 1, 1], [], []>} : vector<8x8xf32>, vector<8x4xf32>, vector<8x4xf32> -> vector<8x4xf32>
    %c0_22 = arith.constant 0 : index
    %c8 = arith.constant 8 : index
    %57 = vector.load %arg6[%c0_22, %c8] : memref<8x32xf32, #tpu.memory_space<vmem>>, vector<8x4xf32>
    tpu.vector_store %arg6[%c0_22, %c8], %56 {strides = array<i32>} : memref<8x32xf32, #tpu.memory_space<vmem>>, vector<8x4xf32>,
    %58 = vector.extract_strided_slice %3 {offsets = [0, 12], sizes = [8, 4], strides = [1, 1]} : vector<8x96xf32> to vector<8x4xf32>
    %59 = vector.extract_strided_slice %3 {offsets = [0, 44], sizes = [8, 4], strides = [1, 1]} : vector<8x96xf32> to vector<8x4xf32>
    %60 = vector.extract_strided_slice %3 {offsets = [0, 76], sizes = [8, 4], strides = [1, 1]} : vector<8x96xf32> to vector<8x4xf32>
    %cst_23 = arith.constant dense<0.000000e+00> : vector<8x8xf32>
    %61 = tpu.matmul %58, %59, %cst_23 {dimension_numbers = #tpu.dot_dimension_numbers<[1], [1], [0], [0], [0, 0, 1, 0], [], []>} : vector<8x4xf32>, vector<8x4xf32>, vector<8x8xf32> -> vector<8x8xf32>
    %cst_24 = arith.constant 5.000000e-01 : f32
    %62 = vector.broadcast %cst_24 : f32 to vector<8x8xf32>
    %63 = arith.mulf %61, %62 : vector<8x8xf32>
    %cst_25 = arith.constant dense<0xFF800000> : vector<8xf32>
    %64 = vector.multi_reduction <maximumf>, %63, %cst_25 [1] : vector<8x8xf32> to vector<8xf32>
    %65 = vector.shape_cast %64 : vector<8xf32> to vector<8x1xf32>
    %66 = vector.broadcast %65 : vector<8x1xf32> to vector<8x8xf32>
    %67 = arith.subf %63, %66 : vector<8x8xf32>
    %68 = math.exp %67 : vector<8x8xf32>
    %cst_26 = arith.constant dense<0.000000e+00> : vector<8xf32>
    %69 = vector.multi_reduction <add>, %68, %cst_26 [1] : vector<8x8xf32> to vector<8xf32>
    %70 = vector.shape_cast %69 : vector<8xf32> to vector<8x1xf32>
    %71 = tpu.reciprocal %70 {approx = true} : vector<8x1xf32> -> vector<8x1xf32>
    %72 = vector.broadcast %71 : vector<8x1xf32> to vector<8x8xf32>
    %73 = arith.mulf %68, %72 : vector<8x8xf32>
    %cst_27 = arith.constant dense<0.000000e+00> : vector<8x4xf32>
    %74 = tpu.matmul %73, %60, %cst_27 {dimension_numbers = #tpu.dot_dimension_numbers<[1], [0], [0], [1], [0, 0, 1, 1], [], []>} : vector<8x8xf32>, vector<8x4xf32>, vector<8x4xf32> -> vector<8x4xf32>
    %c0_28 = arith.constant 0 : index
    %c12 = arith.constant 12 : index
    %75 = vector.load %arg6[%c0_28, %c12] : memref<8x32xf32, #tpu.memory_space<vmem>>, vector<8x4xf32>
    tpu.vector_store %arg6[%c0_28, %c12], %74 {strides = array<i32>} : memref<8x32xf32, #tpu.memory_space<vmem>>, vector<8x4xf32>,
    %76 = vector.extract_strided_slice %3 {offsets = [0, 16], sizes = [8, 4], strides = [1, 1]} : vector<8x96xf32> to vector<8x4xf32>
    %77 = vector.extract_strided_slice %3 {offsets = [0, 48], sizes = [8, 4], strides = [1, 1]} : vector<8x96xf32> to vector<8x4xf32>
    %78 = vector.extract_strided_slice %3 {offsets = [0, 80], sizes = [8, 4], strides = [1, 1]} : vector<8x96xf32> to vector<8x4xf32>
    %cst_29 = arith.constant dense<0.000000e+00> : vector<8x8xf32>
    %79 = tpu.matmul %76, %77, %cst_29 {dimension_numbers = #tpu.dot_dimension_numbers<[1], [1], [0], [0], [0, 0, 1, 0], [], []>} : vector<8x4xf32>, vector<8x4xf32>, vector<8x8xf32> -> vector<8x8xf32>
    %cst_30 = arith.constant 5.000000e-01 : f32
    %80 = vector.broadcast %cst_30 : f32 to vector<8x8xf32>
    %81 = arith.mulf %79, %80 : vector<8x8xf32>
    %cst_31 = arith.constant dense<0xFF800000> : vector<8xf32>
    %82 = vector.multi_reduction <maximumf>, %81, %cst_31 [1] : vector<8x8xf32> to vector<8xf32>
    %83 = vector.shape_cast %82 : vector<8xf32> to vector<8x1xf32>
    %84 = vector.broadcast %83 : vector<8x1xf32> to vector<8x8xf32>
    %85 = arith.subf %81, %84 : vector<8x8xf32>
    %86 = math.exp %85 : vector<8x8xf32>
    %cst_32 = arith.constant dense<0.000000e+00> : vector<8xf32>
    %87 = vector.multi_reduction <add>, %86, %cst_32 [1] : vector<8x8xf32> to vector<8xf32>
    %88 = vector.shape_cast %87 : vector<8xf32> to vector<8x1xf32>
    %89 = tpu.reciprocal %88 {approx = true} : vector<8x1xf32> -> vector<8x1xf32>
    %90 = vector.broadcast %89 : vector<8x1xf32> to vector<8x8xf32>
    %91 = arith.mulf %86, %90 : vector<8x8xf32>
    %cst_33 = arith.constant dense<0.000000e+00> : vector<8x4xf32>
    %92 = tpu.matmul %91, %78, %cst_33 {dimension_numbers = #tpu.dot_dimension_numbers<[1], [0], [0], [1], [0, 0, 1, 1], [], []>} : vector<8x8xf32>, vector<8x4xf32>, vector<8x4xf32> -> vector<8x4xf32>
    %c0_34 = arith.constant 0 : index
    %c16 = arith.constant 16 : index
    %93 = vector.load %arg6[%c0_34, %c16] : memref<8x32xf32, #tpu.memory_space<vmem>>, vector<8x4xf32>
    tpu.vector_store %arg6[%c0_34, %c16], %92 {strides = array<i32>} : memref<8x32xf32, #tpu.memory_space<vmem>>, vector<8x4xf32>,
    %94 = vector.extract_strided_slice %3 {offsets = [0, 20], sizes = [8, 4], strides = [1, 1]} : vector<8x96xf32> to vector<8x4xf32>
    %95 = vector.extract_strided_slice %3 {offsets = [0, 52], sizes = [8, 4], strides = [1, 1]} : vector<8x96xf32> to vector<8x4xf32>
    %96 = vector.extract_strided_slice %3 {offsets = [0, 84], sizes = [8, 4], strides = [1, 1]} : vector<8x96xf32> to vector<8x4xf32>
    %cst_35 = arith.constant dense<0.000000e+00> : vector<8x8xf32>
    %97 = tpu.matmul %94, %95, %cst_35 {dimension_numbers = #tpu.dot_dimension_numbers<[1], [1], [0], [0], [0, 0, 1, 0], [], []>} : vector<8x4xf32>, vector<8x4xf32>, vector<8x8xf32> -> vector<8x8xf32>
    %cst_36 = arith.constant 5.000000e-01 : f32
    %98 = vector.broadcast %cst_36 : f32 to vector<8x8xf32>
    %99 = arith.mulf %97, %98 : vector<8x8xf32>
    %cst_37 = arith.constant dense<0xFF800000> : vector<8xf32>
    %100 = vector.multi_reduction <maximumf>, %99, %cst_37 [1] : vector<8x8xf32> to vector<8xf32>
    %101 = vector.shape_cast %100 : vector<8xf32> to vector<8x1xf32>
    %102 = vector.broadcast %101 : vector<8x1xf32> to vector<8x8xf32>
    %103 = arith.subf %99, %102 : vector<8x8xf32>
    %104 = math.exp %103 : vector<8x8xf32>
    %cst_38 = arith.constant dense<0.000000e+00> : vector<8xf32>
    %105 = vector.multi_reduction <add>, %104, %cst_38 [1] : vector<8x8xf32> to vector<8xf32>
    %106 = vector.shape_cast %105 : vector<8xf32> to vector<8x1xf32>
    %107 = tpu.reciprocal %106 {approx = true} : vector<8x1xf32> -> vector<8x1xf32>
    %108 = vector.broadcast %107 : vector<8x1xf32> to vector<8x8xf32>
    %109 = arith.mulf %104, %108 : vector<8x8xf32>
    %cst_39 = arith.constant dense<0.000000e+00> : vector<8x4xf32>
    %110 = tpu.matmul %109, %96, %cst_39 {dimension_numbers = #tpu.dot_dimension_numbers<[1], [0], [0], [1], [0, 0, 1, 1], [], []>} : vector<8x8xf32>, vector<8x4xf32>, vector<8x4xf32> -> vector<8x4xf32>
    %c0_40 = arith.constant 0 : index
    %c20 = arith.constant 20 : index
    %111 = vector.load %arg6[%c0_40, %c20] : memref<8x32xf32, #tpu.memory_space<vmem>>, vector<8x4xf32>
    tpu.vector_store %arg6[%c0_40, %c20], %110 {strides = array<i32>} : memref<8x32xf32, #tpu.memory_space<vmem>>, vector<8x4xf32>,
    %112 = vector.extract_strided_slice %3 {offsets = [0, 24], sizes = [8, 4], strides = [1, 1]} : vector<8x96xf32> to vector<8x4xf32>
    %113 = vector.extract_strided_slice %3 {offsets = [0, 56], sizes = [8, 4], strides = [1, 1]} : vector<8x96xf32> to vector<8x4xf32>
    %114 = vector.extract_strided_slice %3 {offsets = [0, 88], sizes = [8, 4], strides = [1, 1]} : vector<8x96xf32> to vector<8x4xf32>
    %cst_41 = arith.constant dense<0.000000e+00> : vector<8x8xf32>
    %115 = tpu.matmul %112, %113, %cst_41 {dimension_numbers = #tpu.dot_dimension_numbers<[1], [1], [0], [0], [0, 0, 1, 0], [], []>} : vector<8x4xf32>, vector<8x4xf32>, vector<8x8xf32> -> vector<8x8xf32>
    %cst_42 = arith.constant 5.000000e-01 : f32
    %116 = vector.broadcast %cst_42 : f32 to vector<8x8xf32>
    %117 = arith.mulf %115, %116 : vector<8x8xf32>
    %cst_43 = arith.constant dense<0xFF800000> : vector<8xf32>
    %118 = vector.multi_reduction <maximumf>, %117, %cst_43 [1] : vector<8x8xf32> to vector<8xf32>
    %119 = vector.shape_cast %118 : vector<8xf32> to vector<8x1xf32>
    %120 = vector.broadcast %119 : vector<8x1xf32> to vector<8x8xf32>
    %121 = arith.subf %117, %120 : vector<8x8xf32>
    %122 = math.exp %121 : vector<8x8xf32>
    %cst_44 = arith.constant dense<0.000000e+00> : vector<8xf32>
    %123 = vector.multi_reduction <add>, %122, %cst_44 [1] : vector<8x8xf32> to vector<8xf32>
    %124 = vector.shape_cast %123 : vector<8xf32> to vector<8x1xf32>
    %125 = tpu.reciprocal %124 {approx = true} : vector<8x1xf32> -> vector<8x1xf32>
    %126 = vector.broadcast %125 : vector<8x1xf32> to vector<8x8xf32>
    %127 = arith.mulf %122, %126 : vector<8x8xf32>
    %cst_45 = arith.constant dense<0.000000e+00> : vector<8x4xf32>
    %128 = tpu.matmul %127, %114, %cst_45 {dimension_numbers = #tpu.dot_dimension_numbers<[1], [0], [0], [1], [0, 0, 1, 1], [], []>} : vector<8x8xf32>, vector<8x4xf32>, vector<8x4xf32> -> vector<8x4xf32>
    %c0_46 = arith.constant 0 : index
    %c24 = arith.constant 24 : index
    %129 = vector.load %arg6[%c0_46, %c24] : memref<8x32xf32, #tpu.memory_space<vmem>>, vector<8x4xf32>
    tpu.vector_store %arg6[%c0_46, %c24], %128 {strides = array<i32>} : memref<8x32xf32, #tpu.memory_space<vmem>>, vector<8x4xf32>,
    %130 = vector.extract_strided_slice %3 {offsets = [0, 28], sizes = [8, 4], strides = [1, 1]} : vector<8x96xf32> to vector<8x4xf32>
    %131 = vector.extract_strided_slice %3 {offsets = [0, 60], sizes = [8, 4], strides = [1, 1]} : vector<8x96xf32> to vector<8x4xf32>
    %132 = vector.extract_strided_slice %3 {offsets = [0, 92], sizes = [8, 4], strides = [1, 1]} : vector<8x96xf32> to vector<8x4xf32>
    %cst_47 = arith.constant dense<0.000000e+00> : vector<8x8xf32>
    %133 = tpu.matmul %130, %131, %cst_47 {dimension_numbers = #tpu.dot_dimension_numbers<[1], [1], [0], [0], [0, 0, 1, 0], [], []>} : vector<8x4xf32>, vector<8x4xf32>, vector<8x8xf32> -> vector<8x8xf32>
    %cst_48 = arith.constant 5.000000e-01 : f32
    %134 = vector.broadcast %cst_48 : f32 to vector<8x8xf32>
    %135 = arith.mulf %133, %134 : vector<8x8xf32>
    %cst_49 = arith.constant dense<0xFF800000> : vector<8xf32>
    %136 = vector.multi_reduction <maximumf>, %135, %cst_49 [1] : vector<8x8xf32> to vector<8xf32>
    %137 = vector.shape_cast %136 : vector<8xf32> to vector<8x1xf32>
    %138 = vector.broadcast %137 : vector<8x1xf32> to vector<8x8xf32>
    %139 = arith.subf %135, %138 : vector<8x8xf32>
    %140 = math.exp %139 : vector<8x8xf32>
    %cst_50 = arith.constant dense<0.000000e+00> : vector<8xf32>
    %141 = vector.multi_reduction <add>, %140, %cst_50 [1] : vector<8x8xf32> to vector<8xf32>
    %142 = vector.shape_cast %141 : vector<8xf32> to vector<8x1xf32>
    %143 = tpu.reciprocal %142 {approx = true} : vector<8x1xf32> -> vector<8x1xf32>
    %144 = vector.broadcast %143 : vector<8x1xf32> to vector<8x8xf32>
    %145 = arith.mulf %140, %144 : vector<8x8xf32>
    %cst_51 = arith.constant dense<0.000000e+00> : vector<8x4xf32>
    %146 = tpu.matmul %145, %132, %cst_51 {dimension_numbers = #tpu.dot_dimension_numbers<[1], [0], [0], [1], [0, 0, 1, 1], [], []>} : vector<8x8xf32>, vector<8x4xf32>, vector<8x4xf32> -> vector<8x4xf32>
    %c0_52 = arith.constant 0 : index
    %c28 = arith.constant 28 : index
    %147 = vector.load %arg6[%c0_52, %c28] : memref<8x32xf32, #tpu.memory_space<vmem>>, vector<8x4xf32>
    tpu.vector_store %arg6[%c0_52, %c28], %146 {strides = array<i32>} : memref<8x32xf32, #tpu.memory_space<vmem>>, vector<8x4xf32>,
    %c0_53 = arith.constant 0 : index
    %c0_54 = arith.constant 0 : index
    %148 = vector.load %arg6[%c0_53, %c0_54] : memref<8x32xf32, #tpu.memory_space<vmem>>, vector<8x32xf32>
    %c0_55 = arith.constant 0 : index
    %c0_56 = arith.constant 0 : index
    %149 = vector.load %arg3[%c0_55, %c0_56] : memref<32x32xf32, #tpu.memory_space<vmem>>, vector<32x32xf32>
    %cst_57 = arith.constant dense<0.000000e+00> : vector<8x32xf32>
    %150 = tpu.matmul %148, %149, %cst_57 {dimension_numbers = #tpu.dot_dimension_numbers<[1], [0], [0], [1], [0, 0, 1, 1], [], []>} : vector<8x32xf32>, vector<32x32xf32>, vector<8x32xf32> -> vector<8x32xf32>
    %c0_58 = arith.constant 0 : index
    %c0_59 = arith.constant 0 : index
    %151 = vector.load %arg4[%c0_58, %c0_59] : memref<1x32xf32, #tpu.memory_space<vmem>>, vector<1x32xf32>
    %152 = vector.broadcast %151 : vector<1x32xf32> to vector<8x32xf32>
    %153 = arith.addf %150, %152 : vector<8x32xf32>
    %c0_60 = arith.constant 0 : index
    %c0_61 = arith.constant 0 : index
    %c0_62 = arith.constant 0 : index
    %154 = vector.load %arg5[%c0_60, %c0_61, %c0_62] : memref<1x8x32xf32, #tpu.memory_space<vmem>>, vector<1x8x32xf32>
    %155 = vector.shape_cast %154 : vector<1x8x32xf32> to vector<8x32xf32>
    %156 = vector.shape_cast %153 : vector<8x32xf32> to vector<1x8x32xf32>
    tpu.vector_store %arg5[%c0_60, %c0_61, %c0_62], %156 {strides = array<i32>} : memref<1x8x32xf32, #tpu.memory_space<vmem>>, vector<1x8x32xf32>,
    return
  }
  func.func @transform_0(%arg0: i32) -> (i32, i32, i32) {
    %c0_i32 = arith.constant 0 : i32
    %c0_i32_0 = arith.constant 0 : i32
    %c0_i32_1 = arith.constant 0 : i32
    return %arg0, %c0_i32, %c0_i32_0 : i32, i32, i32
  }
  func.func @transform_1(%arg0: i32) -> (i32, i32) {
    %c0_i32 = arith.constant 0 : i32
    %c0_i32_0 = arith.constant 0 : i32
    %c0_i32_1 = arith.constant 0 : i32
    return %c0_i32, %c0_i32_0 : i32, i32
  }
  func.func @transform_2(%arg0: i32) -> (i32, i32) {
    %c0_i32 = arith.constant 0 : i32
    %c0_i32_0 = arith.constant 0 : i32
    %c0_i32_1 = arith.constant 0 : i32
    return %c0_i32, %c0_i32_0 : i32, i32
  }
  func.func @transform_3(%arg0: i32) -> (i32, i32) {
    %c0_i32 = arith.constant 0 : i32
    %c0_i32_0 = arith.constant 0 : i32
    %c0_i32_1 = arith.constant 0 : i32
    return %c0_i32, %c0_i32_0 : i32, i32
  }
  func.func @transform_4(%arg0: i32) -> (i32, i32, i32) {
    %c0_i32 = arith.constant 0 : i32
    %c0_i32_0 = arith.constant 0 : i32
    %c0_i32_1 = arith.constant 0 : i32
    return %arg0, %c0_i32, %c0_i32_0 : i32, i32, i32
  }
}

</mosaic_0001>

<bundles_post_ra>
// kernel: tpu_custom_call.1
= control target key start
LH: loop header
LB: loop body
LE: loop exit
PB: predicated region body
PF: predicated region fallthrough
CT: control target
= control target key end

     0   :  { %9 = vsyncpa [#allocation4], 0  ;;  %s2829_s0 = inlined_call_operand.hbm [shape: f32[2,8,32], index: 0, kind: input, shape index: {}]   ;;  %s2830_s1 = inlined_call_operand.hbm [shape: f32[32,96], index: 1, kind: input, shape index: {}]   ;;  %s2831_s2 = inlined_call_operand.hbm [shape: f32[32,32], index: 2, kind: input, shape index: {}]   ;;  %s2832_s3 = inlined_call_operand.vmem [shape: f32[1,32], index: 3, kind: input, shape index: {}]   ;;  %s2833_s4 = inlined_call_operand.hbm [shape: f32[2,8,32], index: 4, kind: output, shape index: {}]  }
   0x1   :  { %11 = vsyncpa [#allocation4 + $0x1], 0 }
   0x2   :  { %12 = vsyncpa [#allocation7], 0 }
   0x3   :  { %13 = vsyncpa [#allocation5], 0 }
   0x4   :  { %15 = vsyncpa [#allocation5 + $0x1], 0  ;;  %s2437_s15 = smov 0   ;;  %s2439_s16 = smov 0  }
   0x5   :  { %s2441_s17 = smov 0   ;;  %s2443_s18 = smov 0  }
   0x6 LB: > { %s2458_s19 = sadd.s32 4294967295, %s2371_s18   ;;  %s1882_s20 = sadd.s32 4294967294, %s2371_s18   ;;  %s2371_s18 = sphi %s2443_s18, %s2853_s18   ;;  %s2367_s17 = sphi %s2441_s17, %s2852_s17   ;;  %s2363_s16 = sphi %s2439_s16, %s2851_s16   ;;  %s2359_s15 = sphi %s2437_s15, %s2850_s15  }
   0x7   : > { %p41_p0 = scmp.ne.s32.totalorder %s2363_s16, %s2359_s15  ;;  %p2834_p1 = scmp.eq.s32.totalorder %s2458_s19, 0 }
   0x8   : > { %p134_p3 = scmp.eq.s32.totalorder %s1882_s20, 1  ;;  %p1883_p5 = scmp.ge.s32.totalorder %s2371_s18, 1 }
   0x9   : > { %p2467_p4 = por %p2834_p1, %p41_p0  ;;  %p141_p7 = scmp.lt.s32.totalorder %s2371_s18, 3 }
   0xa   : > { %p2472_p6 = por %p134_p3, %p41_p0  ;;  %s2373_s24 = smov [#allocation6]  }
   0xb   : > { %s2837_s21 = scalar_select %p2467_p4, 1, 0 }
   0xc   : > { %s2838_s22 = scalar_select %p2472_p6, 1, 0 }
   0xd   : > { %p2477_p8 = pnand %p1883_p5, %p141_p7  ;;  %s153_s25 = sshll.u32 %s2373_s24, 4  ;;  %s2481_s25 = int_to_ptr.vmem [resolvable:$true] %s153_s25 }
   0xe   : > { %s2374_s27 = smov [#allocation8]   ;;  %s2215_s5 = scalar_lea.hbm %s2830_s1, 512 }
   0xf   : > { %p2093_p9 = pneg %p2477_p8  ;;  %s166_s28 = sshll.u32 %s2374_s27, 4  ;;  %s2492_s28 = int_to_ptr.vmem [resolvable:$true] %s166_s28 }
  0x10   : > { %p2216_p12 = scmp.ne.s32.totalorder %s2830_s1, %s2215_s5  ;;  %p2222_p5 = scmp.lt.u32.totalorder %s2215_s5, %s2830_s1 }
  0x11   : > { %p2488_p11 = pnand %p2093_p9, %p2834_p1 }
  0x13   : > { %p2217_p13 = pneg %p2488_p11 }
  0x15   : > { %p2218_p0 = pnand %p2217_p13, %p2216_p12 }
  0x17   : > { %p2219_p3 = pneg %p2218_p0 }
  0x19   : > { %p2224_p7 = pnand %p2222_p5, %p2219_p3 }
  0x1b   : > { %2227 = shalt.err (!%p2224_p7)
}
  0x1c   : > { %s2228_s10 = scalar_lea.vmem %s2481_s25, 512  ;;  %p2236_p2 = scmp.lt.s32.totalorder %s2481_s25, %s2481_s25 }
  0x1d   : > { %p2229_p9 = scmp.ne.s32.totalorder %s2481_s25, %s2228_s10  ;;  %p2237_p12 = scmp.lt.s32.totalorder %s2228_s10, %s2228_s10 }
  0x1f   : > { %p2231_p10 = pnand %p2229_p9, %p2217_p13  ;;  %p2238_p0 = por %p2237_p12, %p2236_p2 }
  0x21   : > { %p2232_p1 = pneg %p2231_p10 }
  0x23   : > { %p2239_p6 = pnand %p2238_p0, %p2232_p1 }
  0x25   : > { %2242 = shalt.err (!%p2239_p6)
}
  0x26   : > { %s2375_s11 = smov 128   ;;  %s2376_s12 = smov 8  }
  0x27   : > { %2096 = dma.hbm_to_vmem [thread:$0]  (!%p2488_p11), %s2830_s1, 512, %s2481_s25, [#allocation7], %s2375_s11, %s2375_s11, %s2376_s12  }
  0x28   : > { %s2243_s27 = scalar_lea.hbm %s2831_s2, 512 }
  0x29   : > { %p2244_p2 = scmp.ne.s32.totalorder %s2831_s2, %s2243_s27  ;;  %p2250_p10 = scmp.lt.u32.totalorder %s2243_s27, %s2831_s2 }
  0x2b   : > { %p2246_p1 = pnand %p2244_p2, %p2217_p13 }
  0x2d   : > { %p2247_p6 = pneg %p2246_p1 }
  0x2f   : > { %p2252_p3 = pnand %p2250_p10, %p2247_p6 }
  0x31   : > { %2255 = shalt.err (!%p2252_p3)
}
  0x32   : > { %s2256_s25 = scalar_lea.vmem %s2492_s28, 512  ;;  %p2264_p12 = scmp.lt.s32.totalorder %s2492_s28, %s2492_s28 }
  0x33   : > { %p2257_p5 = scmp.ne.s32.totalorder %s2492_s28, %s2256_s25  ;;  %p2265_p0 = scmp.lt.s32.totalorder %s2256_s25, %s2256_s25 }
  0x35   : > { %p2259_p7 = pnand %p2257_p5, %p2217_p13  ;;  %p2266_p2 = por %p2265_p0, %p2264_p12 }
  0x37   : > { %p2260_p9 = pneg %p2259_p7 }
  0x39   : > { %p2267_p1 = pnand %p2266_p2, %p2260_p9 }
  0x3b   : > { %2270 = shalt.err (!%p2267_p1)
}
  0x3c   : > { %2099 = dma.hbm_to_vmem [thread:$0]  (!%p2488_p11), %s2831_s2, 512, %s2492_s28, [#allocation7], %s2375_s11, %s2375_s11, %s2376_s12  }
  0x3d   : > { %s2547_s9 = sadd.s32 1, %s2371_s18   ;;  %s28_s26 = sadd.s32 1, %s2367_s17 }
  0x3e   : > { %s25_s10 = ssub.s32 %s2371_s18, %s2547_s9  ;;  %p35_p13 = scmp.ne.s32.totalorder %s2367_s17, %s2363_s16 }
  0x3f   : > { %p26_p6 = scmp.eq.s32.totalorder %s25_s10, 0  ;;  %p36_p10 = scmp.eq.s32.totalorder %s2371_s18, 0 }
  0x40   : > { %p2841_p3 = scmp.eq.s32.totalorder %s2458_s19, 1  ;;  %p2110_p7 = scmp.lt.s32.totalorder %s2371_s18, 2 }
  0x41   : > { %s2563_s14 = scalar_select %p26_p6, %s2367_s17, %s28_s26  }
  0x42   : > { %p2557_p5 = por %p2841_p3, %p35_p13  ;;  %p37_p9 = por %p36_p10, %p35_p13 }
  0x43   : > { %s183_s20 = sand.u32 1, %s2367_s17   ;;  %s1888_s28 = sshll.u32 %s2371_s18, 7 }
  0x44   : > { %s2842_s13 = scalar_select %p2557_p5, 1, 0 }
  0x45   : > { %s1887_s24 = sshll.u32 %s183_s20, 3  ;;  %s2570_s27 = scalar_lea.hbm %s2829_s0, %s1888_s28 }
  0x46   : > { %s187_s29 = scalar_lea.vmem [#allocation3], %s1887_s24  ;;  %p2574_p11 = pnand %p2110_p7, %p37_p9 }
  0x47   : > { %s194_s30 = sshll.u32 %s187_s29, 4  ;;  %s184_s6 = scalar_lea.sflag [#allocation4], %s183_s20  ;;  %s2572_s30 = int_to_ptr.vmem [resolvable:$true] %s194_s30 }
  0x48   : > { %s2271_s25 = scalar_lea.hbm %s2570_s27, 128  ;;  %p2273_p0 = pneg %p2574_p11 }
  0x49   : > { %p2272_p12 = scmp.ne.s32.totalorder %s2570_s27, %s2271_s25  ;;  %s2276_s26 = scalar_lea.hbm %s2829_s0, 256 }
  0x4a   : > { %p2277_p13 = scmp.lt.u32.totalorder %s2570_s27, %s2829_s0  ;;  %p2278_p6 = scmp.lt.u32.totalorder %s2276_s26, %s2271_s25 }
  0x4b   : > { %p2274_p2 = pnand %p2273_p0, %p2272_p12  ;;  %p2280_p3 = scmp.lt.u32.totalorder %s2271_s25, %s2570_s27 }
  0x4c   : > { %p2279_p10 = por %p2278_p6, %p2277_p13 }
  0x4d   : > { %p2275_p1 = pneg %p2274_p2 }
  0x4e   : > { %p2281_p7 = por %p2280_p3, %p2279_p10 }
  0x50   : > { %p2282_p9 = pnand %p2281_p7, %p2275_p1 }
  0x52   : > { %2285 = shalt.err (!%p2282_p9)
}
  0x53   : > { %s2286_s20 = scalar_lea.vmem %s2572_s30, 128  ;;  %s2377_s28 = smov [#allocation3]  }
  0x54   : > { %p2287_p12 = scmp.ne.s32.totalorder %s2572_s30, %s2286_s20  ;;  %s2291_s11 = sshll.u32 %s2377_s28, 4  ;;  %s2292_s11 = int_to_ptr.vmem [resolvable:$false] %s2291_s11 }
  0x55   : > { %s2293_s12 = scalar_lea.vmem %s2292_s11, 256  ;;  %p2294_p4 = scmp.lt.s32.totalorder %s2572_s30, %s2292_s11 }
  0x56   : > { %p2289_p2 = pnand %p2287_p12, %p2273_p0  ;;  %p2295_p13 = scmp.lt.s32.totalorder %s2293_s12, %s2286_s20 }
  0x58   : > { %p2290_p5 = pneg %p2289_p2  ;;  %p2296_p6 = por %p2295_p13, %p2294_p4 }
  0x5a   : > { %p2297_p10 = pnand %p2296_p6, %p2290_p5 }
  0x5c   : > { %2300 = shalt.err (!%p2297_p10)
}
  0x5d   : > { %2103 = dma.hbm_to_vmem [thread:$0]  (!%p2574_p11), %s2570_s27, 128, %s2572_s30, %s184_s6  }
  0x5e   : > { %203 = sbr.rel (%p2477_p8) target bundleno = 2108 (0x83c), region = 36  ;;  %s2606_s29 = sand.u32 (!%p2477_p8), 1, %s2363_s16  }
  0x5f   : > { %s1890_s25 = sshll.u32 (!%p2477_p8), %s2606_s29, 3  ;;  %s206_s7 = scalar_lea.sflag (!%p2477_p8), [#allocation4], %s2606_s29 }
  0x60   : > { %s209_s8 = scalar_lea.vmem (!%p2477_p8), [#allocation3], %s1890_s25  ;;  %p2844_p4 = scmp.ne.s32.totalorder (!%p2477_p8), %s2837_s21, 0 }
  0x65   : > { %2346 = dma.done.wait (%p2844_p4), %s206_s7, 128  }
  0x66   : > { %2348 = vsyncadd (%p2844_p4), %s206_s7, 4294967168  ;;  %p2845_p5 = scmp.eq.s32.totalorder %s2458_s19, 0 }
  0x68   : > { %2350 = dma.done.wait (%p2845_p5), [#allocation7], 1024   ;;  %p2846_p8 = pmov %p2845_p5 }
  0x69   : > { %v2378_v0 = vmov 0.0|0.0   ;;  %vm2379_vm0 = vmmov 0   ;;  %v2380_v1 = vmov 0.0   ;;  %v243_v2 = vld [vmem:[#allocation6] sm:$0xff]  ;;  %v244_v3 = vld [vmem:[#allocation6 + $0x8] sm:$0xff]  ;;  %v245_v4 = vld [vmem:[#allocation6 + $0x10] sm:$0xff] }
  0x6a   : > { %2352 = vsyncadd (%p2846_p8), [#allocation7], 4294966272  ;;  %2069 = vmatprep.subr.bf16.mxu0 %v2378_v0  ;;  %1975 = vmatprep.mubr.msk.f32.mxu0 %vm2379_vm0, %v2380_v1  ;;  %v2070_v5 = vpack.c.bf16 %v244_v3, %v243_v2  ;;  %v246_v6 = vld [vmem:[#allocation6 + $0x18] sm:$0xff]  ;;  %vm247_vm1 = vcmask 261120   ;;  %s2381_s21 = smov 64   ;;  %s2382_s23 = smov 96  }
  0x6b   : > { %1978 = vmatprep.subr.mxu1 %v2380_v1  ;;  %1980 = vmatprep.mubr.msk.f32.mxu1 %vm2379_vm0, %v2380_v1  ;;  %v2073_v7 = vpack.c.bf16 %v246_v6, %v245_v4  ;;  %v242_v8 = vld [vmem:[%s209_s8] sm:$0xff]  ;;  %s2383_s27 = smov 92   ;;  %s2384_s30 = smov 124   ;;  %vm324_vm2 = vcmask 31744   ;;  %vm400_vm3 = vcmask 64512   ;;  %vm659_vm4 = vcmask 64544  }
  0x6c   : > { %2071 = vmatpush3.bf16.msra.mxu0 %v2070_v5  ;;  %s2385_s5 = smov 88   ;;  %s2386_s6 = smov 120   ;;  %vm831_vm5 = vcmask 97344   ;;  %vm1003_vm6 = vcmask 130144   ;;  %vm1175_vm7 = vcmask 162944   ;;  %vm1347_vm8 = vcmask 195744  }
  0x6d   : > { %2072 = vmatprep.subr.bf16.mxu0 %v2378_v0  ;;  %s2387_s26 = smov 116   ;;  %s2388_s10 = smov 84   ;;  %vm1519_vm9 = vcmask 228544   ;;  %vm1691_vm10 = vcmask 261344  }
  0x6e   : > { %s2389_s24 = smov 72   ;;  %s2390_s20 = smov 68  }
  0x6f   : > { %s2391_s28 = smov 80   ;;  %s2392_s11 = smov 112  }
  0x70   : > { %2074 = vmatpush3.bf16.msra.mxu0 %v2073_v7  ;;  %s2393_s12 = smov 76   ;;  %s2394_s7 = smov 108  }
  0x71   : > { %1998 = vmatprep.subr.mxu0 %v2380_v1  ;;  %s2395_s8 = smov 104   ;;  %p2847_p0 = scmp.ne.s32.totalorder %s2842_s13, 0 }
  0x73   : > { %1976 = vmatmul.mubr.msk.f32.vlgmr.msra.gmra.mrb[0].mxu0 %vm247_vm1, %v242_v8 }
  0x74   : > { %2000 = vmatprep.mubr.msk.f32.mxu0 %vm2379_vm0, %v2380_v1 }
 0x146   : > { %v2631_v9 = vpop.f32.mrb[0].mxu0 }
 0x147   : > { %412 = vrot.lane.b32.xlu1 %v2631_v9, %s2381_s21  ;;  %322 = vrot.lane.b32.xlu0 %v2631_v9, %s2382_s23  ;;  %v1977_v10 = vpop.f32.mrb[1].mxu0  ;;  %s2396_s21 = smov 100   ;;  %s2397_s23 = smov 60  }
 0x14b   : > { %491 = vrot.lane.b32.xlu1 %v2631_v9, %s2383_s27  ;;  %s2398_s27 = smov 52  }
 0x14f   : > { %489 = vrot.lane.b32.xlu1 %v2631_v9, %s2384_s30  ;;  %s2399_s30 = smov 48  }
 0x153   : > { %663 = vrot.lane.b32.xlu1 %v2631_v9, %s2385_s5  ;;  %s2400_s5 = smov 56  }
 0x157   : > { %661 = vrot.lane.b32.xlu1 %v2631_v9, %s2386_s6  ;;  %s2401_s6 = smov 40  }
 0x15b   : > { %833 = vrot.lane.b32.xlu1 %v2631_v9, %s2387_s26  ;;  %s2402_s26 = smov 44  }
 0x1b9   : > { %v413_v11 = vpop.permute.xlu1 %412  ;;  %v323_v12 = vpop.permute.xlu0 %322 }
 0x1ba   : > { %1979 = vmatpush3.xpose.msk.msra.mxu1 %vm324_vm2, %v323_v12 }
 0x1bb   : > { %1983 = vmatprep.subr.mxu1 %v2380_v1 }
 0x1bd   : > { %v2642_v13 = vpop.permute.xlu1 %491  ;;  %1981 = vmatmul.mubr.msk.f32.vlgmr.msra.gmra.mrb[0].mxu1 %vm324_vm2, %v2631_v9 }
 0x1be   : > { %1984 = vmatpush3.msra.mxu1 %v413_v11  ;;  %1985 = vmatprep.mubr.msk.f32.mxu1 %vm2379_vm0, %v2380_v1 }
 0x1bf   : > { %1988 = vmatprep.subr.mxu1 %v2380_v1 }
 0x1c1   : > { %v2649_v14 = vpop.permute.xlu1 %489 }
 0x1c5   : > { %v664_v15 = vpop.permute.xlu1 %663 }
 0x1c6   : > { %1999 = vmatpush3.xpose.msk.msra.mxu0 %vm324_vm2, %v664_v15 }
 0x1c7   : > { %2008 = vmatprep.subr.mxu0 %v2380_v1 }
 0x1c9   : > { %v662_v16 = vpop.permute.xlu1 %661 }
 0x1ca   : > { %2001 = vmatmul.mubr.msk.f32.vlgmr.msra.gmra.mrb[2].mxu0 %vm324_vm2, %v662_v16 }
 0x1cb   : > { %2010 = vmatprep.mubr.msk.f32.mxu0 %vm2379_vm0, %v2380_v1 }
 0x1cd   : > { %v834_v27 = vpop.permute.xlu1 %833 }
 0x290   : > { %v395_v17 = vpop.f32.mrb[0].mxu1 }
 0x291   : > { %v399_v18 = vmul.f32 0.5, %v395_v17  ;;  %v1982_v19 = vpop.f32.mrb[1].mxu1 }
 0x293   : > { %v401_v20 = vsel %vm400_vm3, %v399_v18, -inf }
 0x294   : > { %402 = vmax.xlane.f32.xlu0 %v401_v20 }
 0x29d   : > { %v735_v21 = vpop.f32.mrb[2].mxu0 }
 0x29e   : > { %v2002_v22 = vpop.f32.mrb[3].mxu0  ;;  %v739_v30 = vmul.f32 0.5, %v735_v21 }
 0x2a0   : > { %v740_v31 = vsel %vm400_vm3, %v739_v30, -inf }
 0x2aa   : > { %835 = vrot.lane.b32.xlu0 %v2631_v9, %s2388_s10  ;;  %s2403_s10 = smov 36  }
 0x2ae   : > { %1351 = vrot.lane.b32.xlu0 %v2631_v9, %s2389_s24  ;;  %s2404_s24 = smov 4  }
 0x2b2   : > { %1523 = vrot.lane.b32.xlu0 %v2631_v9, %s2390_s20  ;;  %s2405_s20 = smov 8  }
 0x321   : > { %v403_v23 = vpop.xlane.xlu0 %402 }
 0x322   : > { %v404_v24 = vsub.f32 %v399_v18, %v403_v23 }
 0x324   : > { %v405_v25 = vmul.f32 1.442695, %v404_v24 }
 0x325   : > { %v836_v26 = vpop.permute.xlu0 %835 }
 0x326   : > { %2183 = vpow2.f32 %v405_v25  ;;  %2009 = vmatpush3.xpose.msk.msra.mxu0 %vm324_vm2, %v836_v26 }
 0x327   : > { %2018 = vmatprep.subr.mxu0 %v2380_v1 }
 0x329   : > { %2011 = vmatmul.mubr.msk.f32.vlgmr.msra.gmra.mrb[4].mxu0 %vm324_vm2, %v834_v27  ;;  %v1352_v38 = vpop.permute.xlu0 %1351 }
 0x32a   : > { %2020 = vmatprep.mubr.msk.f32.mxu0 %vm2379_vm0, %v2380_v1 }
 0x32d   : > { %v1524_v41 = vpop.permute.xlu0 %1523 }
 0x330   : > { %v2184_v28 = vpop.eup %2183 }
 0x331   : > { %v407_v29 = vsel %vm400_vm3, %v2184_v28, 0.0 }
 0x332   : > { %408 = vadd.xlane.f32.xlu1 %v407_v29 }
 0x343   : > { %1007 = vrot.lane.b32.xlu1 %v2631_v9, %s2391_s28  ;;  %s2406_s28 = smov 12  }
 0x347   : > { %1005 = vrot.lane.b32.xlu1 %v2631_v9, %s2392_s11  ;;  %s2407_s11 = smov 16  }
 0x34b   : > { %1179 = vrot.lane.b32.xlu1 %v2631_v9, %s2393_s12  ;;  %s2408_s12 = smov 20  }
 0x34f   : > { %1177 = vrot.lane.b32.xlu1 %v2631_v9, %s2394_s7  ;;  %s2409_s7 = smov 24  }
 0x353   : > { %1349 = vrot.lane.b32.xlu1 %v2631_v9, %s2395_s8  ;;  %s2410_s8 = smov 28  }
 0x357   : > { %1521 = vrot.lane.b32.xlu1 %v2631_v9, %s2396_s21 }
 0x37b   : > { %741 = vmax.xlane.f32.xlu1 %v740_v31 }
 0x3bf   : > { %v409_v32 = vpop.xlane.xlu1 %408 }
 0x3c0   : > { %2185 = vrcp.f32 %v409_v32 }
 0x3c3   : > { %v1008_v33 = vpop.permute.xlu1 %1007 }
 0x3c4   : > { %2019 = vmatpush3.xpose.msk.msra.mxu0 %vm324_vm2, %v1008_v33 }
 0x3c5   : > { %2028 = vmatprep.subr.mxu0 %v2380_v1 }
 0x3c7   : > { %v1006_v34 = vpop.permute.xlu1 %1005 }
 0x3c8   : > { %2021 = vmatmul.mubr.msk.f32.vlgmr.msra.gmra.mrb[6].mxu0 %vm324_vm2, %v1006_v34 }
 0x3c9   : > { %2030 = vmatprep.mubr.msk.f32.mxu0 %vm2379_vm0, %v2380_v1 }
 0x3ca   : > { %v2186_v35 = vpop.eup %2185 }
 0x3cb   : > { %v411_v36 = vmul.f32 %v2186_v35, %v2184_v28  ;;  %v1180_v37 = vpop.permute.xlu1 %1179 }
 0x3cc   : > { %2029 = vmatpush3.xpose.msk.msra.mxu0 %vm324_vm2, %v1180_v37 }
 0x3cd   : > { %1986 = vmatmul.mubr.msk.f32.vlgmr.msra.gmra.mrb[2].mxu1 %vm400_vm3, %v411_v36  ;;  %2038 = vmatprep.subr.mxu0 %v2380_v1 }
 0x3ce   : > { %1989 = vmatpush3.xpose.msk.msra.mxu1 %vm324_vm2, %v2642_v13  ;;  %1990 = vmatprep.mubr.msk.f32.mxu1 %vm2379_vm0, %v2380_v1 }
 0x3cf   : > { %v1178_v39 = vpop.permute.xlu1 %1177  ;;  %1993 = vmatprep.subr.mxu1 %v2380_v1 }
 0x3d0   : > { %2031 = vmatmul.mubr.msk.f32.vlgmr.msra.gmra.mrb[8].mxu0 %vm324_vm2, %v1178_v39 }
 0x3d1   : > { %2039 = vmatpush3.xpose.msk.msra.mxu0 %vm324_vm2, %v1352_v38  ;;  %1991 = vmatmul.mubr.msk.f32.vlgmr.msra.gmra.mrb[4].mxu1 %vm324_vm2, %v2649_v14 }
 0x3d2   : > { %2040 = vmatprep.mubr.msk.f32.mxu0 %vm2379_vm0, %v2380_v1  ;;  %2048 = vmatprep.subr.mxu0 %v2380_v1 }
 0x3d3   : > { %v1350_v40 = vpop.permute.xlu1 %1349  ;;  %1995 = vmatprep.mubr.msk.f32.mxu1 %vm2379_vm0, %v2380_v1 }
 0x3d4   : > { %2041 = vmatmul.mubr.msk.f32.vlgmr.msra.gmra.mrb[10].mxu0 %vm324_vm2, %v1350_v40 }
 0x3d5   : > { %2049 = vmatpush3.xpose.msk.msra.mxu0 %vm324_vm2, %v1524_v41  ;;  %2050 = vmatprep.mubr.msk.f32.mxu0 %vm2379_vm0, %v2380_v1 }
 0x3d6   : > { %2075 = vmatprep.subr.bf16.mxu0 %v2378_v0 }
 0x3d7   : > { %v1522_v42 = vpop.permute.xlu1 %1521 }
 0x3d8   : > { %2051 = vmatmul.mubr.msk.f32.vlgmr.msra.gmra.mrb[12].mxu0 %vm324_vm2, %v1522_v42 }
 0x3d9   : > { %2066 = vmatprep.mubr.msk.f32.mxu0 %vm2379_vm0, %v2380_v1 }
 0x3fc   : > { %v907_v43 = vpop.f32.mrb[4].mxu0 }
 0x3fd   : > { %v2012_v44 = vpop.f32.mrb[5].mxu0  ;;  %v911_v59 = vmul.f32 0.5, %v907_v43 }
 0x3ff   : > { %v912_v3 = vsel %vm400_vm3, %v911_v59, -inf }
 0x408   : > { %v742_v45 = vpop.xlane.xlu1 %741 }
 0x409   : > { %v743_v48 = vsub.f32 %v739_v30, %v742_v45 }
 0x40b   : > { %v744_v50 = vmul.f32 1.442695, %v743_v48 }
 0x40d   : > { %2187 = vpow2.f32 %v744_v50 }
 0x417   : > { %v2708_v7 = vpop.eup %2187 }
 0x418   : > { %v746_v11 = vsel %vm400_vm3, %v2708_v7, 0.0 }
 0x49b   : > { %v1079_v46 = vpop.f32.mrb[6].mxu0 }
 0x49c   : > { %v2022_v47 = vpop.f32.mrb[7].mxu0  ;;  %v1083_v63 = vmul.f32 0.5, %v1079_v46 }
 0x49e   : > { %v1084_v10 = vsel %vm400_vm3, %v1083_v63, -inf }
 0x4a0   : > { %v484_v49 = vpop.f32.mrb[2].mxu1 }
 0x4a1   : > { %488 = vst.msk [vmem:[#allocation2] sm:$0xff] %vm324_vm2, %v484_v49  ;;  %v1987_v51 = vpop.f32.mrb[3].mxu1 }
 0x4a3   : > { %v1251_v52 = vpop.f32.mrb[8].mxu0 }
 0x4a4   : > { %v1255_v53 = vmul.f32 0.5, %v1251_v52  ;;  %v563_v54 = vpop.f32.mrb[4].mxu1  ;;  %v2032_v55 = vpop.f32.mrb[9].mxu0 }
 0x4a5   : > { %v567_v56 = vmul.f32 0.5, %v563_v54  ;;  %v1992_v57 = vpop.f32.mrb[5].mxu1 }
 0x4a6   : > { %v1256_v58 = vsel %vm400_vm3, %v1255_v53, -inf }
 0x4a7   : > { %1257 = vmax.xlane.f32.xlu1 %v1256_v58  ;;  %v1423_v60 = vpop.f32.mrb[10].mxu0  ;;  %v568_v61 = vsel %vm400_vm3, %v567_v56, -inf }
 0x4a8   : > { %569 = vmax.xlane.f32.xlu0 %v568_v61  ;;  %v2042_v62 = vpop.f32.mrb[11].mxu0  ;;  %v1427_v8 = vmul.f32 0.5, %v1423_v60 }
 0x4aa   : > { %v1428_v12 = vsel %vm400_vm3, %v1427_v8, -inf }
 0x4ab   : > { %v1595_v2 = vpop.f32.mrb[12].mxu0 }
 0x4ac   : > { %v1599_v4 = vmul.f32 0.5, %v1595_v2  ;;  %913 = vmax.xlane.f32.xlu0 %v912_v3  ;;  %v2052_v5 = vpop.f32.mrb[13].mxu0 }
 0x4ae   : > { %v1600_v6 = vsel %vm400_vm3, %v1599_v4, -inf }
 0x4af   : > { %1601 = vmax.xlane.f32.xlu1 %v1600_v6 }
 0x4b0   : > { %1085 = vmax.xlane.f32.xlu0 %v1084_v10 }
 0x4b3   : > { %747 = vadd.xlane.f32.xlu1 %v746_v11 }
 0x4b4   : > { %1429 = vmax.xlane.f32.xlu0 %v1428_v12 }
 0x534   : > { %v1258_v13 = vpop.xlane.xlu1 %1257 }
 0x535   : > { %v570_v14 = vpop.xlane.xlu0 %569  ;;  %v1259_v15 = vsub.f32 %v1255_v53, %v1258_v13 }
 0x536   : > { %v571_v24 = vsub.f32 %v567_v56, %v570_v14 }
 0x537   : > { %v1260_v18 = vmul.f32 1.442695, %v1259_v15 }
 0x538   : > { %v572_v29 = vmul.f32 1.442695, %v571_v24 }
 0x539   : > { %v914_v16 = vpop.xlane.xlu0 %913 }
 0x53a   : > { %v915_v17 = vsub.f32 %v911_v59, %v914_v16  ;;  %v1694_v16 = vld [vmem:[#allocation8] sm:$0xff] }
 0x53c   : > { %v916_v19 = vmul.f32 1.442695, %v915_v17  ;;  %v1602_v20 = vpop.xlane.xlu1 %1601  ;;  %v1695_v17 = vld [vmem:[#allocation8 + $0x8] sm:$0xff] }
 0x53d   : > { %v1603_v21 = vsub.f32 %v1599_v4, %v1602_v20  ;;  %v1086_v22 = vpop.xlane.xlu0 %1085  ;;  %v1697_v20 = vld [vmem:[#allocation8 + $0x18] sm:$0xff] }
 0x53e   : > { %2189 = vpow2.f32 %v916_v19  ;;  %v1087_v23 = vsub.f32 %v1083_v63, %v1086_v22  ;;  %v2076_v19 = vpack.c.bf16 %v1695_v17, %v1694_v16 }
 0x53f   : > { %2191 = vpow2.f32 %v1260_v18  ;;  %v1604_v25 = vmul.f32 1.442695, %v1603_v21 }
 0x540   : > { %v1088_v26 = vmul.f32 1.442695, %v1087_v23  ;;  %v748_v43 = vpop.xlane.xlu1 %747  ;;  %2077 = vmatpush3.bf16.msra.mxu0 %v2076_v19 }
 0x541   : > { %v1430_v27 = vpop.xlane.xlu0 %1429  ;;  %2078 = vmatprep.subr.bf16.mxu0 %v2378_v0 }
 0x542   : > { %2193 = vpow2.f32 %v1088_v26  ;;  %v1431_v28 = vsub.f32 %v1427_v8, %v1430_v27 }
 0x543   : > { %2195 = vpow2.f32 %v1604_v25 }
 0x544   : > { %v1432_v30 = vmul.f32 1.442695, %v1431_v28 }
 0x546   : > { %2197 = vpow2.f32 %v1432_v30 }
 0x547   : > { %2199 = vpow2.f32 %v572_v29 }
 0x548   : > { %v2714_v31 = vpop.eup %2189 }
 0x549   : > { %v918_v32 = vsel %vm400_vm3, %v2714_v31, 0.0  ;;  %v2718_v33 = vpop.eup %2191 }
 0x54a   : > { %919 = vadd.xlane.f32.xlu0 %v918_v32  ;;  %v1262_v35 = vsel %vm400_vm3, %v2718_v33, 0.0 }
 0x54c   : > { %v2720_v34 = vpop.eup %2193 }
 0x54d   : > { %v1090_v36 = vsel %vm400_vm3, %v2720_v34, 0.0  ;;  %v2726_v37 = vpop.eup %2195 }
 0x54e   : > { %1263 = vadd.xlane.f32.xlu0 %v1262_v35  ;;  %1091 = vadd.xlane.f32.xlu1 %v1090_v36  ;;  %v1606_v40 = vsel %vm400_vm3, %v2726_v37, 0.0  ;;  %v1919_v35 = vld [vmem:[%s2832_s3] ss:$0 sm:$0xff] }
 0x550   : > { %v2728_v38 = vpop.eup %2197 }
 0x551   : > { %v1434_v39 = vsel %vm400_vm3, %v2728_v38, 0.0  ;;  %v2200_v41 = vpop.eup %2199 }
 0x552   : > { %1435 = vadd.xlane.f32.xlu1 %v1434_v39  ;;  %1607 = vadd.xlane.f32.xlu0 %v1606_v40  ;;  %v574_v42 = vsel %vm400_vm3, %v2200_v41, 0.0 }
 0x556   : > { %575 = vadd.xlane.f32.xlu0 %v574_v42 }
 0x563   : > { %579 = vrot.lane.b32.xlu1 %v2631_v9, %s2397_s23 }
 0x567   : > { %923 = vrot.lane.b32.xlu1 %v2631_v9, %s2398_s27  ;;  %s1922_s27 = sshll.u32 %s2458_s19, 7 }
 0x56b   : > { %1095 = vrot.lane.b32.xlu1 %v2631_v9, %s2399_s30  ;;  %s241_s30 = scalar_lea.vmem [#allocation9], %s1890_s25  ;;  %s2411_s25 = smov [#allocation9]  }
 0x56c   : > { %751 = vrot.lane.b32.xlu0 %v2631_v9, %s2400_s5  ;;  %s1793_s5 = sshll.u32 %s241_s30, 4  ;;  %s2786_s5 = int_to_ptr.vmem [resolvable:$true] %s1793_s5 }
 0x56d   : > { %s2301_s19 = scalar_lea.vmem %s2786_s5, 128 }
 0x56e   : > { %p2302_p11 = scmp.ne.s32.totalorder %s2786_s5, %s2301_s19 }
 0x56f   : > { %1439 = vrot.lane.b32.xlu1 %v2631_v9, %s2401_s6 }
 0x570   : > { %1267 = vrot.lane.b32.xlu0 %v2631_v9, %s2402_s26  ;;  %p2303_p1 = pnand %p2302_p11, %p2847_p0 }
 0x572   : > { %p2304_p3 = pneg %p2303_p1 }
 0x574   : > { %1611 = vrot.lane.b32.xlu0 %v2631_v9, %s2403_s10  ;;  %s2784_s10 = scalar_lea.hbm %s2833_s4, %s1922_s27 }
 0x5d7   : > { %v920_v44 = vpop.xlane.xlu0 %919 }
 0x5db   : > { %v1264_v45 = vpop.xlane.xlu0 %1263  ;;  %v1092_v46 = vpop.xlane.xlu1 %1091 }
 0x5df   : > { %v1608_v47 = vpop.xlane.xlu0 %1607  ;;  %v1436_v48 = vpop.xlane.xlu1 %1435 }
 0x5e3   : > { %v576_v49 = vpop.xlane.xlu0 %575  ;;  %v580_v50 = vpop.permute.xlu1 %579 }
 0x5e4   : > { %2201 = vrcp.f32 %v576_v49  ;;  %1994 = vmatpush3.msra.mxu1 %v580_v50 }
 0x5e5   : > { %2003 = vmatprep.subr.mxu1 %v2380_v1  ;;  %2203 = vrcp.f32 %v748_v43 }
 0x5e6   : > { %2205 = vrcp.f32 %v920_v44 }
 0x5e7   : > { %2207 = vrcp.f32 %v1092_v46  ;;  %v752_v54 = vpop.permute.xlu0 %751  ;;  %v924_v55 = vpop.permute.xlu1 %923 }
 0x5e8   : > { %2209 = vrcp.f32 %v1264_v45 }
 0x5e9   : > { %2211 = vrcp.f32 %v1436_v48 }
 0x5ea   : > { %2213 = vrcp.f32 %v1608_v47 }
 0x5eb   : > { %v1096_v59 = vpop.permute.xlu1 %1095  ;;  %v1268_v62 = vpop.permute.xlu0 %1267 }
 0x5ee   : > { %v2202_v51 = vpop.eup %2201 }
 0x5ef   : > { %v578_v52 = vmul.f32 %v2202_v51, %v2200_v41  ;;  %v2204_v53 = vpop.eup %2203  ;;  %v1440_v3 = vpop.permute.xlu1 %1439 }
 0x5f0   : > { %v750_v9 = vmul.f32 %v2204_v53, %v2708_v7  ;;  %v2206_v56 = vpop.eup %2205  ;;  %v1612_v6 = vpop.permute.xlu0 %1611 }
 0x5f1   : > { %1996 = vmatmul.mubr.msk.f32.vlgmr.msra.gmra.mrb[6].mxu1 %vm400_vm3, %v578_v52  ;;  %v922_v57 = vmul.f32 %v2206_v56, %v2714_v31  ;;  %v2208_v58 = vpop.eup %2207 }
 0x5f2   : > { %2004 = vmatpush3.msra.mxu1 %v752_v54  ;;  %2005 = vmatprep.mubr.msk.f32.mxu1 %vm2379_vm0, %v2380_v1  ;;  %v1094_v60 = vmul.f32 %v2208_v58, %v2720_v34  ;;  %v2210_v61 = vpop.eup %2209 }
 0x5f3   : > { %2013 = vmatprep.subr.mxu1 %v2380_v1  ;;  %v1266_v63 = vmul.f32 %v2210_v61, %v2718_v33  ;;  %v2212_v2 = vpop.eup %2211 }
 0x5f4   : > { %v1438_v4 = vmul.f32 %v2212_v2, %v2728_v38  ;;  %v2214_v5 = vpop.eup %2213 }
 0x5f5   : > { %2006 = vmatmul.mubr.msk.f32.vlgmr.msra.gmra.mrb[8].mxu1 %vm400_vm3, %v750_v9  ;;  %v1610_v7 = vmul.f32 %v2214_v5, %v2726_v37 }
 0x5f6   : > { %2014 = vmatpush3.msra.mxu1 %v924_v55  ;;  %2015 = vmatprep.mubr.msk.f32.mxu1 %vm2379_vm0, %v2380_v1 }
 0x5f7   : > { %2023 = vmatprep.subr.mxu1 %v2380_v1 }
 0x5f9   : > { %2016 = vmatmul.mubr.msk.f32.vlgmr.msra.gmra.mrb[10].mxu1 %vm400_vm3, %v922_v57 }
 0x5fa   : > { %2024 = vmatpush3.msra.mxu1 %v1096_v59  ;;  %2025 = vmatprep.mubr.msk.f32.mxu1 %vm2379_vm0, %v2380_v1 }
 0x5fb   : > { %2033 = vmatprep.subr.mxu1 %v2380_v1 }
 0x5fd   : > { %2026 = vmatmul.mubr.msk.f32.vlgmr.msra.gmra.mrb[12].mxu1 %vm400_vm3, %v1094_v60 }
 0x5fe   : > { %2034 = vmatpush3.msra.mxu1 %v1268_v62  ;;  %2035 = vmatprep.mubr.msk.f32.mxu1 %vm2379_vm0, %v2380_v1 }
 0x5ff   : > { %2043 = vmatprep.subr.mxu1 %v2380_v1 }
 0x601   : > { %2036 = vmatmul.mubr.msk.f32.vlgmr.msra.gmra.mrb[14].mxu1 %vm400_vm3, %v1266_v63 }
 0x602   : > { %2044 = vmatpush3.msra.mxu1 %v1440_v3  ;;  %2045 = vmatprep.mubr.msk.f32.mxu1 %vm2379_vm0, %v2380_v1 }
 0x603   : > { %2053 = vmatprep.subr.mxu1 %v2380_v1 }
 0x605   : > { %2046 = vmatmul.mubr.msk.f32.vlgmr.msra.gmra.mrb[16].mxu1 %vm400_vm3, %v1438_v4 }
 0x606   : > { %2054 = vmatpush3.msra.mxu1 %v1612_v6  ;;  %2055 = vmatprep.mubr.msk.f32.mxu1 %vm2379_vm0, %v2380_v1  ;;  %v1696_v1 = vld [vmem:[#allocation8 + $0x10] sm:$0xff] }
 0x607   : > { %v2079_v21 = vpack.c.bf16 %v1697_v20, %v1696_v1 }
 0x609   : > { %2056 = vmatmul.mubr.msk.f32.vlgmr.msra.gmra.mrb[18].mxu1 %vm400_vm3, %v1610_v7  ;;  %2080 = vmatpush3.bf16.msra.mxu0 %v2079_v21 }
 0x6c4   : > { %v651_v8 = vpop.f32.mrb[6].mxu1 }
 0x6c5   : > { %656 = vrot.lane.b32.xlu1 %v651_v8, %s2404_s24  ;;  %v1997_v10 = vpop.f32.mrb[7].mxu1  ;;  %s1780_s24 = scalar_lea.sflag [#allocation5], %s2606_s29 }
 0x6c8   : > { %v823_v11 = vpop.f32.mrb[8].mxu1 }
 0x6c9   : > { %828 = vrot.lane.b32.xlu0 %v823_v11, %s2405_s20  ;;  %v2007_v12 = vpop.f32.mrb[9].mxu1  ;;  %s2305_s20 = sshll.u32 %s2411_s25, 4  ;;  %s2306_s20 = int_to_ptr.vmem [resolvable:$false] %s2305_s20 }
 0x6ca   : > { %p2308_p7 = scmp.lt.s32.totalorder %s2786_s5, %s2306_s20 }
 0x6cc   : > { %v995_v13 = vpop.f32.mrb[10].mxu1 }
 0x6cd   : > { %1000 = vrot.lane.b32.xlu1 %v995_v13, %s2406_s28  ;;  %v2017_v14 = vpop.f32.mrb[11].mxu1  ;;  %s2307_s28 = scalar_lea.vmem %s2306_s20, 256 }
 0x6ce   : > { %p2309_p9 = scmp.lt.s32.totalorder %s2307_s28, %s2301_s19 }
 0x6d0   : > { %v1167_v15 = vpop.f32.mrb[12].mxu1  ;;  %p2310_p12 = por %p2309_p9, %p2308_p7 }
 0x6d1   : > { %1172 = vrot.lane.b32.xlu0 %v1167_v15, %s2407_s11  ;;  %v2027_v18 = vpop.f32.mrb[13].mxu1 }
 0x6d2   : > { %p2311_p2 = pnand %p2310_p12, %p2304_p3 }
 0x6d4   : > { %v1339_v22 = vpop.f32.mrb[14].mxu1 }
 0x6d5   : > { %1344 = vrot.lane.b32.xlu1 %v1339_v22, %s2408_s12  ;;  %v2037_v23 = vpop.f32.mrb[15].mxu1 }
 0x6d8   : > { %v1511_v24 = vpop.f32.mrb[16].mxu1 }
 0x6d9   : > { %1516 = vrot.lane.b32.xlu0 %v1511_v24, %s2409_s7  ;;  %v2047_v25 = vpop.f32.mrb[17].mxu1 }
 0x6dc   : > { %v1683_v26 = vpop.f32.mrb[18].mxu1 }
 0x6dd   : > { %1688 = vrot.lane.b32.xlu1 %v1683_v26, %s2410_s8  ;;  %v2057_v27 = vpop.f32.mrb[19].mxu1 }
 0x737   : > { %v657_v28 = vpop.permute.xlu1 %656 }
 0x738   : > { %660 = vst.msk [vmem:[#allocation2] sm:$0xff] %vm659_vm4, %v657_v28 }
 0x73b   : > { %v829_v29 = vpop.permute.xlu0 %828 }
 0x73c   : > { %832 = vst.msk [vmem:[#allocation2] sm:$0xff] %vm831_vm5, %v829_v29 }
 0x73f   : > { %v1001_v0 = vpop.permute.xlu1 %1000 }
 0x740   : > { %1004 = vst.msk [vmem:[#allocation2] sm:$0xff] %vm1003_vm6, %v1001_v0 }
 0x743   : > { %v1173_v30 = vpop.permute.xlu0 %1172 }
 0x744   : > { %1176 = vst.msk [vmem:[#allocation2] sm:$0xff] %vm1175_vm7, %v1173_v30 }
 0x747   : > { %v1345_v31 = vpop.permute.xlu1 %1344 }
 0x748   : > { %1348 = vst.msk [vmem:[#allocation2] sm:$0xff] %vm1347_vm8, %v1345_v31 }
 0x74b   : > { %v1517_v32 = vpop.permute.xlu0 %1516 }
 0x74c   : > { %1520 = vst.msk [vmem:[#allocation2] sm:$0xff] %vm1519_vm9, %v1517_v32 }
 0x74f   : > { %v1689_v33 = vpop.permute.xlu1 %1688 }
 0x750   : > { %1692 = vst.msk [vmem:[#allocation2] sm:$0xff] %vm1691_vm10, %v1689_v33 }
 0x757   : > { %v1693_v34 = vld [vmem:[#allocation2] sm:$0xff] }
 0x758   : > { %2067 = vmatmul.mubr.msk.f32.vlgmr.msra.gmra.mrb[14].mxu0 %vm247_vm1, %v1693_v34 }
 0x82b   : > { %v1774_v36 = vpop.f32.mrb[14].mxu0 }
 0x82c   : > { %v1775_v37 = vadd.f32 %v1919_v35, %v1774_v36  ;;  %v2068_v38 = vpop.f32.mrb[15].mxu0 }
 0x82e   : > { %1778 = vst.msk [vmem:[%s241_s30] sm:$0xff] %vm247_vm1, %v1775_v37 }
 0x82f   : > { %2314 = shalt.err (!%p2311_p2)
}
 0x830   : > { %s2315_s29 = scalar_lea.hbm %s2784_s10, 128  ;;  %s2319_s7 = scalar_lea.hbm %s2833_s4, 256 }
 0x831   : > { %p2316_p13 = scmp.ne.s32.totalorder %s2784_s10, %s2315_s29  ;;  %p2320_p4 = scmp.lt.u32.totalorder %s2784_s10, %s2833_s4 }
 0x832   : > { %p2321_p5 = scmp.lt.u32.totalorder %s2319_s7, %s2315_s29  ;;  %p2323_p11 = scmp.lt.u32.totalorder %s2315_s29, %s2784_s10 }
 0x833   : > { %p2317_p6 = pnand %p2316_p13, %p2847_p0 }
 0x834   : > { %p2322_p8 = por %p2321_p5, %p2320_p4 }
 0x835   : > { %p2318_p10 = pneg %p2317_p6 }
 0x836   : > { %p2324_p1 = por %p2323_p11, %p2322_p8 }
 0x838   : > { %p2325_p3 = pnand %p2324_p1, %p2318_p10 }
 0x83a   : > { %2328 = shalt.err (!%p2325_p3)
}
 0x83b   : > { %2091 = dma.vmem_to_hbm [thread:$0]  (%p2847_p0), %s2786_s5, 128, %s2784_s10, %s1780_s24  }
 0x83c PF: > { %s1805_s23 = sand.u32 1, %s2359_s15   ;;  %p2848_p7 = scmp.ne.s32.totalorder %s2838_s22, 0 }
 0x83d   : > { %p2849_p9 = scmp.ge.s32.totalorder %s2371_s18, 2  ;;  %s1806_s27 = scalar_lea.sflag [#allocation5], %s1805_s23 }
 0x83f   : > { %p2105_p12 = pnand %p2849_p9, %p2848_p7 }
 0x841   : > { %2354 = dma.done.wait (!%p2105_p12), %s1806_s27, 128  }
 0x842   : > { %2356 = vsyncadd (!%p2105_p12), %s1806_s27, 4294967168  ;;  %p18_p2 = scmp.ge.s32.totalorder %s2547_s9, 4   ;;  %s2850_s15 = smov %s2363_s16 }
 0x843   : > { %s2851_s16 = smov %s2367_s17  ;;  %s2852_s17 = smov %s2563_s14 }
 0x844   : > { %s2853_s18 = smov %s2547_s9  ;;  %20 = sbr.rel (!%p18_p2) target bundleno = 6 (0x6), region = 89 }
 0x84b   :  { %1811 = vsyncpa [#allocation4], 1 }
 0x84c   :  { %1813 = vsyncpa [#allocation4 + $0x1], 1 }
 0x84d   :  { %1814 = vsyncpa [#allocation7], 1 }
 0x84e   :  { %1815 = vsyncpa [#allocation5], 1 }
 0x84f   :  { %1817 = vsyncpa [#allocation5 + $0x1], 1 }

</bundles_post_ra>
